<compile_context>
chip_gen: v5e
topology: v5e:2x2
jax: 0.10.0
libtpu: 0.0.40
codegen_flags: <defaults>
</compile_context>

<pallas_src>
import jax
import jax.numpy as jnp
from jax.experimental import pallas as pl
from jax.experimental.pallas import tpu as pltpu

Z_DIM = 12
COND_DIM = 24
OUT_DIM = 24          # generator output features
H = 120               # hidden width (hidden_dim * 10)
LANES = 128           # padded feature width (TPU lane count)
K1 = 40               # padded layer-1 contraction width: z(12) | zeros(4) | conds(24)

EPS = 1e-5
NEG_SLOPE = 0.01      # nn.LeakyReLU default

# Row offsets inside the packed weight slab (all starts 8-sublane aligned).
W1_OFF = 0                    # rows   0: 40
W2_OFF = W1_OFF + K1          # rows  40:168 (40:160 real, 160:168 zero)
W3_OFF = W2_OFF + LANES       # rows 168:296 (168:288 real, 288:296 zero)
WSLAB_ROWS = W3_OFF + LANES   # 296

# Row indices inside the packed vector slab (shape (8, 128)).
G1_ROW, BE1_ROW, G2_ROW, BE2_ROW, B3_ROW = 0, 1, 2, 3, 4


def generator_kernel(z_ref, c_ref, w_ref, v_ref, o_ref):
    z = z_ref[...]                                  # (B, 12)
    c = c_ref[...]                                  # (B, 24)
    B = z.shape[0]
    inv_b = jnp.float32(1.0 / B)

    # Static, tile-aligned carves from the packed slabs (zero runtime cost).
    w1 = w_ref[W1_OFF:W1_OFF + K1, :]               # (40, 128)
    w2 = w_ref[W2_OFF:W2_OFF + LANES, :]            # (128, 128)
    w3 = w_ref[W3_OFF:W3_OFF + LANES, :]            # (128, 128)

    g1 = v_ref[G1_ROW:G1_ROW + 1, :]                # (1, 128)
    be1 = v_ref[BE1_ROW:BE1_ROW + 1, :]
    g2 = v_ref[G2_ROW:G2_ROW + 1, :]
    be2 = v_ref[BE2_ROW:BE2_ROW + 1, :]
    b3 = v_ref[B3_ROW:B3_ROW + 1, :]

    def bn_leaky(h, gamma, beta):
        # One-pass training-mode BatchNorm folded into one scale/shift,
        # then LeakyReLU via a single maximum.
        s1 = jnp.sum(h, axis=0, keepdims=True)
        s2 = jnp.sum(h * h, axis=0, keepdims=True)
        mean = s1 * inv_b
        var = jnp.maximum(s2 * inv_b - mean * mean, 0.0)     # biased variance
        scale = gamma * jax.lax.rsqrt(var + EPS)             # gamma/sqrt(var+eps)
        shift = beta - mean * scale
        h = h * scale + shift                                # 2 VPU ops / element
        return jnp.maximum(h, NEG_SLOPE * h)

    # Layer 1: fused torch.cat -> single K=40 MXU dot (b1 cancelled by BN).
    xcat = jnp.concatenate(
        [z, jnp.zeros((B, K1 - Z_DIM - COND_DIM), jnp.float32), c], axis=1)
    h = jnp.dot(xcat, w1, preferred_element_type=jnp.float32)
    h = bn_leaky(h, g1, be1)

    # Layer 2: Linear(120,120) (b2 cancelled by BN) -> BN -> LReLU.
    # Padded lanes 120:128 stay exactly zero (zero gamma) so the zero-padded
    # weight rows contribute nothing.
    h = jnp.dot(h, w2, preferred_element_type=jnp.float32)
    h = bn_leaky(h, g2, be2)

    # Output layer: Linear(120,24); lane-dense 128-wide unmasked store
    # (columns 24: are zero, sliced off in the wrapper).
    o_ref[...] = (jnp.dot(h, w3, preferred_element_type=jnp.float32)
                  + b3).astype(o_ref.dtype)


def pack_params(p):
    """Pack the 11 small parameter arrays into two pre-padded VMEM slabs.

    b1 / b2 are intentionally omitted: training-mode BatchNorm subtracts the
    per-feature batch mean right after the Linear, so they cancel exactly.
    (Eval-mode / running-stats BN would need a different fold.)
    """
    wslab = jnp.zeros((WSLAB_ROWS, LANES), jnp.float32)
    wslab = wslab.at[W1_OFF:W1_OFF + Z_DIM, :H].set(p["w1"][:Z_DIM])
    wslab = wslab.at[W1_OFF + 16:W1_OFF + 16 + COND_DIM, :H].set(p["w1"][Z_DIM:])
    wslab = wslab.at[W2_OFF:W2_OFF + H, :H].set(p["w2"])
    wslab = wslab.at[W3_OFF:W3_OFF + H, :OUT_DIM].set(p["w3"])

    vslab = jnp.zeros((8, LANES), jnp.float32)
    vslab = vslab.at[G1_ROW, :H].set(p["g1"].reshape(-1))
    vslab = vslab.at[BE1_ROW, :H].set(p["be1"].reshape(-1))
    vslab = vslab.at[G2_ROW, :H].set(p["g2"].reshape(-1))
    vslab = vslab.at[BE2_ROW, :H].set(p["be2"].reshape(-1))
    vslab = vslab.at[B3_ROW, :OUT_DIM].set(p["b3"].reshape(-1))
    return wslab, vslab


@jax.jit
def generator_forward(z, conds, wslab, vslab):
    # NOTE: B must be >= 2 — training-mode BN with B=1 gives var=0 -> rsqrt(eps)
    # blow-up (matches PyTorch behaviour).
    B = z.shape[0]
    vmem = pl.BlockSpec(memory_space=pltpu.MemorySpace.VMEM)
    # Advisory cost estimate so XLA schedules this tiny custom call tightly.
    flops = 2 * B * (K1 * LANES + 2 * LANES * LANES) + 16 * B * LANES
    bytes_accessed = 4 * (z.size + conds.size + wslab.size + vslab.size + B * LANES)
    out_padded = pl.pallas_call(
        generator_kernel,
        out_shape=jax.ShapeDtypeStruct((B, LANES), jnp.float32),
        in_specs=[vmem, vmem, vmem, vmem],
        out_specs=vmem,
        cost_estimate=pl.CostEstimate(
            flops=flops, transcendentals=2 * LANES,
            bytes_accessed=bytes_accessed),
    )(z, conds, wslab, vslab)
    return out_padded[:, :OUT_DIM]


def init_params(key):
    # Deterministic synthetic init (uniform, PyTorch-style fan_in scaling).
    def lin(key, fan_in, fan_out):
        k1, k2 = jax.random.split(key)
        bound = 1.0 / jnp.sqrt(jnp.float32(fan_in))
        w = jax.random.uniform(k1, (fan_in, fan_out), jnp.float32, -bound, bound)
        b = jax.random.uniform(k2, (fan_out,), jnp.float32, -bound, bound)
        return w, b

    k1, k2, k3 = jax.random.split(key, 3)
    w1, b1 = lin(k1, Z_DIM + COND_DIM, H)
    w2, b2 = lin(k2, H, H)
    w3, b3 = lin(k3, H, OUT_DIM)
    return {
        "w1": w1, "b1": b1,
        "g1": jnp.ones((H,), jnp.float32), "be1": jnp.zeros((H,), jnp.float32),
        "w2": w2, "b2": b2,
        "g2": jnp.ones((H,), jnp.float32), "be2": jnp.zeros((H,), jnp.float32),
        "w3": w3, "b3": b3,
    }


def _reference(z, conds, p):
    # Pure-JAX reference matching the PyTorch module (includes b1/b2).
    x = jnp.concatenate([z, conds], axis=1)

    def bn(h, g, b):
        m = jnp.mean(h, axis=0, keepdims=True)
        v = jnp.mean((h - m) ** 2, axis=0, keepdims=True)
        return (h - m) / jnp.sqrt(v + EPS) * g + b

    h = x @ p["w1"] + p["b1"]
    h = bn(h, p["g1"], p["be1"])
    h = jnp.where(h > 0, h, NEG_SLOPE * h)
    h = h @ p["w2"] + p["b2"]
    h = bn(h, p["g2"], p["be2"])
    h = jnp.where(h > 0, h, NEG_SLOPE * h)
    return h @ p["w3"] + p["b3"]


if __name__ == "__main__":
    key = jax.random.PRNGKey(0)
    kz, kc, kp = jax.random.split(key, 3)

    B = 8
    z = jax.random.normal(kz, (B, Z_DIM), jnp.float32)
    conds = jax.random.normal(kc, (B, COND_DIM), jnp.float32)
    params = init_params(kp)
    wslab, vslab = pack_params(params)      # one-time packing, off the hot path

    out = generator_forward(z, conds, wslab, vslab)
    out = jax.block_until_ready(out)

    ref = _reference(z, conds, params)
    assert out.shape == (B, OUT_DIM)
    assert bool(jnp.all(jnp.isfinite(out)))
    assert jnp.allclose(out, ref, atol=1e-4, rtol=1e-4), float(
        jnp.max(jnp.abs(out - ref)))

    print("KERNEL_OK")
</pallas_src>

<mosaic_0001>
module attributes {stable_mosaic.version = 11 : i64} {
  func.func @generator_kernel(%arg0: memref<8x12xf32, #tpu.memory_space<vmem>>, %arg1: memref<8x24xf32, #tpu.memory_space<vmem>>, %arg2: memref<296x128xf32, #tpu.memory_space<vmem>>, %arg3: memref<8x128xf32, #tpu.memory_space<vmem>>, %arg4: memref<8x128xf32, #tpu.memory_space<vmem>>) attributes {dimension_semantics = [], scalar_prefetch = 0 : i64, scratch_operands = 0 : i64, tpu.core_type = #tpu.core_type<tc>} {
    %c0 = arith.constant 0 : index
    %c0_0 = arith.constant 0 : index
    %0 = vector.load %arg0[%c0, %c0_0] : memref<8x12xf32, #tpu.memory_space<vmem>>, vector<8x12xf32>
    %c0_1 = arith.constant 0 : index
    %c0_2 = arith.constant 0 : index
    %1 = vector.load %arg1[%c0_1, %c0_2] : memref<8x24xf32, #tpu.memory_space<vmem>>, vector<8x24xf32>
    %c0_3 = arith.constant 0 : index
    %c0_4 = arith.constant 0 : index
    %2 = vector.load %arg2[%c0_3, %c0_4] : memref<296x128xf32, #tpu.memory_space<vmem>>, vector<40x128xf32>
    %c40 = arith.constant 40 : index
    %c0_5 = arith.constant 0 : index
    %3 = vector.load %arg2[%c40, %c0_5] : memref<296x128xf32, #tpu.memory_space<vmem>>, vector<128x128xf32>
    %c168 = arith.constant 168 : index
    %c0_6 = arith.constant 0 : index
    %4 = vector.load %arg2[%c168, %c0_6] : memref<296x128xf32, #tpu.memory_space<vmem>>, vector<128x128xf32>
    %c0_7 = arith.constant 0 : index
    %c0_8 = arith.constant 0 : index
    %5 = vector.load %arg3[%c0_7, %c0_8] : memref<8x128xf32, #tpu.memory_space<vmem>>, vector<1x128xf32>
    %c1 = arith.constant 1 : index
    %c0_9 = arith.constant 0 : index
    %6 = vector.load %arg3[%c1, %c0_9] : memref<8x128xf32, #tpu.memory_space<vmem>>, vector<1x128xf32>
    %c2 = arith.constant 2 : index
    %c0_10 = arith.constant 0 : index
    %7 = vector.load %arg3[%c2, %c0_10] : memref<8x128xf32, #tpu.memory_space<vmem>>, vector<1x128xf32>
    %c3 = arith.constant 3 : index
    %c0_11 = arith.constant 0 : index
    %8 = vector.load %arg3[%c3, %c0_11] : memref<8x128xf32, #tpu.memory_space<vmem>>, vector<1x128xf32>
    %c4 = arith.constant 4 : index
    %c0_12 = arith.constant 0 : index
    %9 = vector.load %arg3[%c4, %c0_12] : memref<8x128xf32, #tpu.memory_space<vmem>>, vector<1x128xf32>
    %cst = arith.constant 0.000000e+00 : f32
    %10 = vector.broadcast %cst : f32 to vector<8x4xf32>
    %11 = tpu.concatenate %0, %10, %1 in 1 : vector<8x12xf32>, vector<8x4xf32>, vector<8x24xf32> -> vector<8x40xf32>
    %cst_13 = arith.constant dense<0.000000e+00> : vector<8x128xf32>
    %12 = tpu.matmul %11, %2, %cst_13 {dimension_numbers = #tpu.dot_dimension_numbers<[1], [0], [0], [1], [0, 0, 1, 1], [], []>} : vector<8x40xf32>, vector<40x128xf32>, vector<8x128xf32> -> vector<8x128xf32>
    %cst_14 = arith.constant dense<0.000000e+00> : vector<128xf32>
    %13 = vector.multi_reduction <add>, %12, %cst_14 [0] : vector<8x128xf32> to vector<128xf32>
    %14 = vector.shape_cast %13 : vector<128xf32> to vector<1x128xf32>
    %15 = arith.mulf %12, %12 : vector<8x128xf32>
    %cst_15 = arith.constant dense<0.000000e+00> : vector<128xf32>
    %16 = vector.multi_reduction <add>, %15, %cst_15 [0] : vector<8x128xf32> to vector<128xf32>
    %17 = vector.shape_cast %16 : vector<128xf32> to vector<1x128xf32>
    %cst_16 = arith.constant 1.250000e-01 : f32
    %18 = vector.broadcast %cst_16 : f32 to vector<1x128xf32>
    %19 = arith.mulf %14, %18 : vector<1x128xf32>
    %cst_17 = arith.constant 1.250000e-01 : f32
    %20 = vector.broadcast %cst_17 : f32 to vector<1x128xf32>
    %21 = arith.mulf %17, %20 : vector<1x128xf32>
    %22 = arith.mulf %19, %19 : vector<1x128xf32>
    %23 = arith.subf %21, %22 : vector<1x128xf32>
    %cst_18 = arith.constant 0.000000e+00 : f32
    %24 = vector.broadcast %cst_18 : f32 to vector<1x128xf32>
    %25 = arith.maximumf %23, %24 : vector<1x128xf32>
    %cst_19 = arith.constant 9.99999974E-6 : f32
    %26 = vector.broadcast %cst_19 : f32 to vector<1x128xf32>
    %27 = arith.addf %25, %26 : vector<1x128xf32>
    %28 = math.rsqrt %27 : vector<1x128xf32>
    %29 = arith.mulf %5, %28 : vector<1x128xf32>
    %30 = arith.mulf %19, %29 : vector<1x128xf32>
    %31 = arith.subf %6, %30 : vector<1x128xf32>
    %32 = vector.broadcast %29 : vector<1x128xf32> to vector<8x128xf32>
    %33 = arith.mulf %12, %32 : vector<8x128xf32>
    %34 = vector.broadcast %31 : vector<1x128xf32> to vector<8x128xf32>
    %35 = arith.addf %33, %34 : vector<8x128xf32>
    %cst_20 = arith.constant 0.00999999977 : f32
    %36 = vector.broadcast %cst_20 : f32 to vector<8x128xf32>
    %37 = arith.mulf %36, %35 : vector<8x128xf32>
    %38 = arith.maximumf %35, %37 : vector<8x128xf32>
    %cst_21 = arith.constant dense<0.000000e+00> : vector<8x128xf32>
    %39 = tpu.matmul %38, %3, %cst_21 {dimension_numbers = #tpu.dot_dimension_numbers<[1], [0], [0], [1], [0, 0, 1, 1], [], []>} : vector<8x128xf32>, vector<128x128xf32>, vector<8x128xf32> -> vector<8x128xf32>
    %cst_22 = arith.constant dense<0.000000e+00> : vector<128xf32>
    %40 = vector.multi_reduction <add>, %39, %cst_22 [0] : vector<8x128xf32> to vector<128xf32>
    %41 = vector.shape_cast %40 : vector<128xf32> to vector<1x128xf32>
    %42 = arith.mulf %39, %39 : vector<8x128xf32>
    %cst_23 = arith.constant dense<0.000000e+00> : vector<128xf32>
    %43 = vector.multi_reduction <add>, %42, %cst_23 [0] : vector<8x128xf32> to vector<128xf32>
    %44 = vector.shape_cast %43 : vector<128xf32> to vector<1x128xf32>
    %cst_24 = arith.constant 1.250000e-01 : f32
    %45 = vector.broadcast %cst_24 : f32 to vector<1x128xf32>
    %46 = arith.mulf %41, %45 : vector<1x128xf32>
    %cst_25 = arith.constant 1.250000e-01 : f32
    %47 = vector.broadcast %cst_25 : f32 to vector<1x128xf32>
    %48 = arith.mulf %44, %47 : vector<1x128xf32>
    %49 = arith.mulf %46, %46 : vector<1x128xf32>
    %50 = arith.subf %48, %49 : vector<1x128xf32>
    %cst_26 = arith.constant 0.000000e+00 : f32
    %51 = vector.broadcast %cst_26 : f32 to vector<1x128xf32>
    %52 = arith.maximumf %50, %51 : vector<1x128xf32>
    %cst_27 = arith.constant 9.99999974E-6 : f32
    %53 = vector.broadcast %cst_27 : f32 to vector<1x128xf32>
    %54 = arith.addf %52, %53 : vector<1x128xf32>
    %55 = math.rsqrt %54 : vector<1x128xf32>
    %56 = arith.mulf %7, %55 : vector<1x128xf32>
    %57 = arith.mulf %46, %56 : vector<1x128xf32>
    %58 = arith.subf %8, %57 : vector<1x128xf32>
    %59 = vector.broadcast %56 : vector<1x128xf32> to vector<8x128xf32>
    %60 = arith.mulf %39, %59 : vector<8x128xf32>
    %61 = vector.broadcast %58 : vector<1x128xf32> to vector<8x128xf32>
    %62 = arith.addf %60, %61 : vector<8x128xf32>
    %cst_28 = arith.constant 0.00999999977 : f32
    %63 = vector.broadcast %cst_28 : f32 to vector<8x128xf32>
    %64 = arith.mulf %63, %62 : vector<8x128xf32>
    %65 = arith.maximumf %62, %64 : vector<8x128xf32>
    %cst_29 = arith.constant dense<0.000000e+00> : vector<8x128xf32>
    %66 = tpu.matmul %65, %4, %cst_29 {dimension_numbers = #tpu.dot_dimension_numbers<[1], [0], [0], [1], [0, 0, 1, 1], [], []>} : vector<8x128xf32>, vector<128x128xf32>, vector<8x128xf32> -> vector<8x128xf32>
    %67 = vector.broadcast %9 : vector<1x128xf32> to vector<8x128xf32>
    %68 = arith.addf %66, %67 : vector<8x128xf32>
    %c0_30 = arith.constant 0 : index
    %c0_31 = arith.constant 0 : index
    %69 = vector.load %arg4[%c0_30, %c0_31] : memref<8x128xf32, #tpu.memory_space<vmem>>, vector<8x128xf32>
    tpu.vector_store %arg4[%c0_30, %c0_31], %68 {strides = array<i32>} : memref<8x128xf32, #tpu.memory_space<vmem>>, vector<8x128xf32>,
    return
  }
}

</mosaic_0001>

<bundles_post_ra>
// kernel: generator_forward.1
= control target key start
LH: loop header
LB: loop body
LE: loop exit
PB: predicated region body
PF: predicated region fallthrough
CT: control target
= control target key end

     0   :  { %9 = vsyncpa [#allocation3], 0  ;;  %s478_s0 = inlined_call_operand.hbm [shape: f32[8,12], index: 0, kind: input, shape index: {}]   ;;  %s479_s1 = inlined_call_operand.hbm [shape: f32[8,24], index: 1, kind: input, shape index: {}]   ;;  %s480_s2 = inlined_call_operand.hbm [shape: f32[296,128], index: 2, kind: input, shape index: {}]   ;;  %s481_s3 = inlined_call_operand.hbm [shape: f32[8,128], index: 3, kind: input, shape index: {}]   ;;  %s482_s4 = inlined_call_operand.hbm [shape: f32[8,128], index: 4, kind: output, shape index: {}]  }
   0x1   :  { %10 = vsyncpa [#allocation6], 0 }
   0x2   :  { %11 = vsyncpa [#allocation9], 0  ;;  %s29_s17 = sshll.u32 %s479_s1, 4  ;;  %s30_s17 = int_to_ptr.hbm [resolvable:$true] %s29_s17 }
   0x3   :  { %12 = vsyncpa [#allocation4], 0  ;;  %s430_s18 = smov [#allocation5]   ;;  %s18_s22 = sshll.u32 %s478_s0, 4  ;;  %s19_s22 = int_to_ptr.hbm [resolvable:$true] %s18_s22 }
   0x4   :  { %s31_s19 = sshll.u32 %s430_s18, 4  ;;  %s431_s23 = smov [#allocation2]   ;;  %s32_s19 = int_to_ptr.vmem [resolvable:$true] %s31_s19 }
   0x5   :  { %34 = dma.hbm_to_vmem [thread:$0]  %s30_s17, 128, %s32_s19, [#allocation6]  }
   0x6   :  { %s20_s24 = sshll.u32 %s431_s23, 4  ;;  %s39_s27 = sshll.u32 %s480_s2, 4  ;;  %s21_s24 = int_to_ptr.vmem [resolvable:$true] %s20_s24  ;;  %s40_s27 = int_to_ptr.hbm [resolvable:$true] %s39_s27 }
   0x7   :  { %23 = dma.hbm_to_vmem [thread:$0]  %s19_s22, 128, %s21_s24, [#allocation3]  }
   0x8   :  { %s432_s1 = smov [#allocation7]   ;;  %s53_s5 = sshll.u32 %s481_s3, 4  ;;  %s54_s5 = int_to_ptr.hbm [resolvable:$true] %s53_s5 }
   0x9   :  { %s41_s28 = sshll.u32 %s432_s1, 4  ;;  %s433_s6 = smov 128   ;;  %s42_s28 = int_to_ptr.vmem [resolvable:$true] %s41_s28 }
   0xa   :  { %s434_s0 = smov 8   ;;  %s435_s7 = smov [#allocation8]  }
   0xb   :  { %47 = dma.hbm_to_vmem [thread:$0]  %s40_s27, 4736, %s42_s28, [#allocation6], %s433_s6, %s433_s6, %s434_s0  }
   0xc   :  { %s55_s8 = sshll.u32 %s435_s7, 4  ;;  %s56_s8 = int_to_ptr.vmem [resolvable:$true] %s55_s8 }
   0xd   :  { %58 = dma.hbm_to_vmem [thread:$0]  %s54_s5, 128, %s56_s8, [#allocation9]  }
   0xe   :  { %422 = dma.done.wait [#allocation3], 128  }
   0xf   :  { %423 = vsyncadd [#allocation3], 4294967168 }
  0x10   :  { %424 = dma.done.wait [#allocation6], 4864  }
  0x11   :  { %425 = vsyncadd [#allocation6], 4294962432 }
  0x12   :  { %426 = dma.done.wait [#allocation9], 128  }
  0x13   :  { %427 = vsyncadd [#allocation9], 4294967168  ;;  %v76_v0 = vld [vmem:[#allocation5] sm:$0xff]  ;;  %v81_v1 = vld [vmem:[#allocation7 + $0x20] sm:$0xff]  ;;  %s436_s2 = smov 16   ;;  %vm123_vm0 = vcmask 97280  }
  0x14   :  { %v80_v2 = vld [vmem:[#allocation7 + $0x18] sm:$0xff]  ;;  %120 = vrot.lane.b32.xlu0 %v76_v0, %s436_s2  ;;  %142 = vmatpush.msra.mxu0 %v81_v1  ;;  %v79_v3 = vld [vmem:[#allocation7 + $0x10] sm:$0xff]  ;;  %v78_v4 = vld [vmem:[#allocation7 + $0x8] sm:$0xff]  ;;  %vm125_vm1 = vcmask 130048   ;;  %vm127_vm2 = vcmask 326656   ;;  %s437_s3 = smov [#allocation10]  }
  0x15   :  { %v77_v5 = vld [vmem:[#allocation7] sm:$0xff]  ;;  %v75_v6 = vld [vmem:[#allocation2] sm:$0xff]  ;;  %v96_v11 = vld [vmem:[#allocation7 + $0x98] sm:$0xff]  ;;  %s274_s9 = sshll.u32 %s437_s3, 4  ;;  %s276_s12 = sshll.u32 %s482_s4, 4  ;;  %s275_s9 = int_to_ptr.vmem [resolvable:$true] %s274_s9  ;;  %s277_s12 = int_to_ptr.hbm [resolvable:$true] %s276_s12 }
  0x16   :  { %143 = vmatpush.msra.mxu0 %v80_v2  ;;  %v124_v7 = vsel %vm123_vm0, %v75_v6, 0.0  ;;  %v97_v10 = vld [vmem:[#allocation7 + $0xa0] sm:$0xff]  ;;  %v95_v12 = vld [vmem:[#allocation7 + $0x90] sm:$0xff]  ;;  %v94_v13 = vld [vmem:[#allocation7 + $0x88] sm:$0xff] }
  0x17   :  { %189 = vmatpush.msra.mxu1 %v97_v10  ;;  %v93_v14 = vld [vmem:[#allocation7 + $0x80] sm:$0xff]  ;;  %v92_v18 = vld [vmem:[#allocation7 + $0x78] sm:$0xff]  ;;  %v91_v21 = vld [vmem:[#allocation7 + $0x70] sm:$0xff] }
  0x18   :  { %144 = vmatpush.msra.mxu0 %v79_v3  ;;  %v90_v24 = vld [vmem:[#allocation7 + $0x68] sm:$0xff]  ;;  %v89_v27 = vld [vmem:[#allocation7 + $0x60] sm:$0xff]  ;;  %v88_v30 = vld [vmem:[#allocation7 + $0x58] sm:$0xff] }
  0x19   :  { %190 = vmatpush.msra.mxu1 %v96_v11  ;;  %v87_v33 = vld [vmem:[#allocation7 + $0x50] sm:$0xff]  ;;  %v86_v36 = vld [vmem:[#allocation7 + $0x48] sm:$0xff]  ;;  %v85_v37 = vld [vmem:[#allocation7 + $0x40] sm:$0xff] }
  0x1a   :  { %145 = vmatpush.msra.mxu0 %v78_v4  ;;  %v84_v40 = vld [vmem:[#allocation7 + $0x38] sm:$0xff]  ;;  %v83_v42 = vld [vmem:[#allocation7 + $0x30] sm:$0xff]  ;;  %v82_v44 = vld [vmem:[#allocation7 + $0x28] sm:$0xff] }
  0x1b   :  { %191 = vmatpush.msra.mxu1 %v95_v12  ;;  %v114_v51 = vld [vmem:[#allocation8] sm:$0x1]  ;;  %v115_v55 = vld [vmem:[#allocation8 + $0x1] sm:$0x1]  ;;  %v113_v0 = vld [vmem:[#allocation7 + $0x120] sm:$0xff] }
  0x1c   :  { %146 = vmatpush.msra.mxu0 %v77_v5  ;;  %248 = vmatpush.msra.mxu2 %v113_v0  ;;  %v112_v1 = vld [vmem:[#allocation7 + $0x118] sm:$0xff]  ;;  %v111_v2 = vld [vmem:[#allocation7 + $0x110] sm:$0xff]  ;;  %v110_v3 = vld [vmem:[#allocation7 + $0x108] sm:$0xff] }
  0x1d   :  { %192 = vmatpush.msra.mxu1 %v94_v13  ;;  %v109_v4 = vld [vmem:[#allocation7 + $0x100] sm:$0xff]  ;;  %v107_v11 = vld [vmem:[#allocation7 + $0xf0] sm:$0xff] }
  0x1e   :  { %249 = vmatpush.msra.mxu2 %v112_v1 }
  0x1f   :  { %193 = vmatpush.msra.mxu1 %v93_v14  ;;  %v106_v14 = vld [vmem:[#allocation7 + $0xe8] sm:$0xff] }
  0x20   :  { %250 = vmatpush.msra.mxu2 %v111_v2 }
  0x21   :  { %194 = vmatpush.msra.mxu1 %v92_v18 }
  0x22   :  { %251 = vmatpush.msra.mxu2 %v110_v3 }
  0x23   :  { %195 = vmatpush.msra.mxu1 %v91_v21 }
  0x24   :  { %252 = vmatpush.msra.mxu2 %v109_v4 }
  0x25   :  { %196 = vmatpush.msra.mxu1 %v90_v24 }
  0x27   :  { %197 = vmatpush.msra.mxu1 %v89_v27  ;;  %v101_v27 = vld [vmem:[#allocation7 + $0xc0] sm:$0xff] }
  0x29   :  { %198 = vmatpush.msra.mxu1 %v88_v30  ;;  %v100_v30 = vld [vmem:[#allocation7 + $0xb8] sm:$0xff] }
  0x2b   :  { %199 = vmatpush.msra.mxu1 %v87_v33 }
  0x2d   :  { %200 = vmatpush.msra.mxu1 %v86_v36 }
  0x2f   :  { %201 = vmatpush.msra.mxu1 %v85_v37 }
  0x31   :  { %202 = vmatpush.msra.mxu1 %v84_v40 }
  0x33   :  { %203 = vmatpush.msra.mxu1 %v83_v42 }
  0x35   :  { %204 = vmatpush.msra.mxu1 %v82_v44 }
  0x86   :  { %v121_v8 = vpop.permute.xlu0 %120 }
  0x87   :  { %v126_v9 = vsel %vm125_vm1, %v124_v7, %v121_v8  ;;  %v108_v8 = vld [vmem:[#allocation7 + $0xf8] sm:$0xff] }
  0x88   :  { %288 = vmatmul.msk.f32.vlgmr.msra.gmra.mxu0 %vm127_vm2, %v126_v9  ;;  %253 = vmatpush.msra.mxu2 %v108_v8 }
  0x8a   :  { %254 = vmatpush.msra.mxu2 %v107_v11 }
  0x8c   :  { %255 = vmatpush.msra.mxu2 %v106_v14 }
 0x105   :  { %v148_v15 = vpop.f32.mrf.mxu0 }
 0x106   :  { %v151_v16 = vrot.slane %v148_v15, 4  ;;  %v157_v17 = vmul.f32 %v148_v15, %v148_v15 }
 0x108   :  { %v152_v19 = vadd.f32 %v151_v16, %v148_v15  ;;  %v158_v20 = vrot.slane %v157_v17, 4 }
 0x10a   :  { %v153_v22 = vrot.slane %v152_v19, 2  ;;  %v159_v23 = vadd.f32 %v158_v20, %v157_v17  ;;  %v105_v17 = vld [vmem:[#allocation7 + $0xe0] sm:$0xff]  ;;  %v104_v20 = vld [vmem:[#allocation7 + $0xd8] sm:$0xff] }
 0x10b   :  { %256 = vmatpush.msra.mxu2 %v105_v17 }
 0x10c   :  { %v154_v25 = vadd.f32 %v153_v22, %v152_v19  ;;  %v160_v26 = vrot.slane %v159_v23, 2 }
 0x10d   :  { %257 = vmatpush.msra.mxu2 %v104_v20 }
 0x10e   :  { %v155_v28 = vrot.slane %v154_v25, 1  ;;  %v161_v29 = vadd.f32 %v160_v26, %v159_v23  ;;  %v103_v23 = vld [vmem:[#allocation7 + $0xd0] sm:$0xff]  ;;  %v102_v26 = vld [vmem:[#allocation7 + $0xc8] sm:$0xff] }
 0x10f   :  { %258 = vmatpush.msra.mxu2 %v103_v23 }
 0x110   :  { %v156_v31 = vadd.f32 %v155_v28, %v154_v25  ;;  %v162_v32 = vrot.slane %v161_v29, 1 }
 0x111   :  { %259 = vmatpush.msra.mxu2 %v102_v26 }
 0x112   :  { %v163_v34 = vadd.f32 %v162_v32, %v161_v29  ;;  %v164_v35 = vmul.f32 0.125, %v156_v31  ;;  %v99_v32 = vld [vmem:[#allocation7 + $0xb0] sm:$0xff] }
 0x113   :  { %260 = vmatpush.msra.mxu2 %v101_v27 }
 0x114   :  { %v165_v38 = vmul.f32 0.125, %v163_v34  ;;  %v166_v39 = vmul.f32 %v164_v35, %v164_v35  ;;  %v98_v34 = vld [vmem:[#allocation7 + $0xa8] sm:$0xff] }
 0x115   :  { %261 = vmatpush.msra.mxu2 %v100_v30 }
 0x116   :  { %v167_v41 = vsub.f32 %v165_v38, %v166_v39 }
 0x117   :  { %262 = vmatpush.msra.mxu2 %v99_v32 }
 0x118   :  { %v168_v43 = vmax.f32 %v167_v41, 0.0  ;;  %v116_v41 = vld [vmem:[#allocation8 + $0x2] sm:$0x1] }
 0x119   :  { %263 = vmatpush.msra.mxu2 %v98_v34 }
 0x11a   :  { %v169_v45 = vadd.f32 1e-05, %v168_v43 }
 0x11c   :  { %298 = vrsqrt.f32 %v169_v45  ;;  %vm176_vm4 = vweird.f32 %v169_v45 }
 0x122   :  { %v299_v46 = vpop.eup %298 }
 0x123   :  { %v171_v47 = vmul.f32 %v299_v46, %v169_v45  ;;  %vm177_vm3 = vweird.f32 %v299_v46  ;;  %v117_v45 = vld [vmem:[#allocation8 + $0x3] sm:$0x1] }
 0x124   :  { %vm178_vm5 = vmor %vm176_vm4, %vm177_vm3 }
 0x125   :  { %v172_v48 = vmul.f32 %v299_v46, %v171_v47 }
 0x127   :  { %v173_v49 = vmul.f32 0.5, %v172_v48 }
 0x129   :  { %v174_v50 = vsub.f32 1.5, %v173_v49 }
 0x12b   :  { %v175_v52 = vmul.f32 %v299_v46, %v174_v50 }
 0x12d   :  { %v179_v53 = vsel %vm178_vm5, %v299_v46, %v175_v52 }
 0x12e   :  { %v180_v54 = vmul.f32 %v179_v53, %v114_v51 }
 0x130   :  { %v183_v56 = vperm.slane %v180_v54, 0  ;;  %v181_v57 = vmul.f32 %v180_v54, %v164_v35  ;;  %v297_v54 = vld [vmem:[#allocation8 + $0x4] ss:$0 sm:$0xff] }
 0x132   :  { %v182_v58 = vsub.f32 %v115_v55, %v181_v57  ;;  %v184_v59 = vmul.f32 %v183_v56, %v148_v15 }
 0x134   :  { %v185_v60 = vperm.slane %v182_v58, 0 }
 0x136   :  { %v186_v61 = vadd.f32 %v185_v60, %v184_v59 }
 0x138   :  { %v187_v62 = vmul.f32 0.01, %v186_v61 }
 0x13a   :  { %v188_v63 = vmax.f32 %v186_v61, %v187_v62 }
 0x13c   :  { %205 = vmatmul.f32.vlgmr.msra.gmra.mxu1 %v188_v63 }
 0x1b9   :  { %v206_v5 = vpop.f32.mrf.mxu1 }
 0x1ba   :  { %v209_v6 = vrot.slane %v206_v5, 4  ;;  %v215_v7 = vmul.f32 %v206_v5, %v206_v5 }
 0x1bc   :  { %v210_v9 = vadd.f32 %v209_v6, %v206_v5  ;;  %v216_v10 = vrot.slane %v215_v7, 4 }
 0x1be   :  { %v211_v12 = vrot.slane %v210_v9, 2  ;;  %v217_v13 = vadd.f32 %v216_v10, %v215_v7 }
 0x1c0   :  { %v212_v15 = vadd.f32 %v211_v12, %v210_v9  ;;  %v218_v16 = vrot.slane %v217_v13, 2 }
 0x1c2   :  { %v213_v18 = vrot.slane %v212_v15, 1  ;;  %v219_v19 = vadd.f32 %v218_v16, %v217_v13 }
 0x1c4   :  { %v214_v21 = vadd.f32 %v213_v18, %v212_v15  ;;  %v220_v22 = vrot.slane %v219_v19, 1 }
 0x1c6   :  { %v221_v24 = vadd.f32 %v220_v22, %v219_v19  ;;  %v222_v25 = vmul.f32 0.125, %v214_v21 }
 0x1c8   :  { %v223_v28 = vmul.f32 0.125, %v221_v24  ;;  %v224_v29 = vmul.f32 %v222_v25, %v222_v25 }
 0x1ca   :  { %v225_v31 = vsub.f32 %v223_v28, %v224_v29 }
 0x1cc   :  { %v226_v33 = vmax.f32 %v225_v31, 0.0 }
 0x1ce   :  { %v227_v35 = vadd.f32 1e-05, %v226_v33 }
 0x1d0   :  { %300 = vrsqrt.f32 %v227_v35  ;;  %vm234_vm7 = vweird.f32 %v227_v35 }
 0x1d6   :  { %v301_v36 = vpop.eup %300 }
 0x1d7   :  { %v229_v37 = vmul.f32 %v301_v36, %v227_v35  ;;  %vm235_vm6 = vweird.f32 %v301_v36 }
 0x1d8   :  { %vm236_vm8 = vmor %vm234_vm7, %vm235_vm6 }
 0x1d9   :  { %v230_v38 = vmul.f32 %v301_v36, %v229_v37 }
 0x1db   :  { %v231_v39 = vmul.f32 0.5, %v230_v38 }
 0x1dd   :  { %v232_v40 = vsub.f32 1.5, %v231_v39 }
 0x1df   :  { %v233_v42 = vmul.f32 %v301_v36, %v232_v40 }
 0x1e1   :  { %v237_v43 = vsel %vm236_vm8, %v301_v36, %v233_v42 }
 0x1e2   :  { %v238_v44 = vmul.f32 %v237_v43, %v116_v41 }
 0x1e4   :  { %v241_v46 = vperm.slane %v238_v44, 0  ;;  %v239_v47 = vmul.f32 %v238_v44, %v222_v25 }
 0x1e6   :  { %v240_v48 = vsub.f32 %v117_v45, %v239_v47  ;;  %v242_v49 = vmul.f32 %v241_v46, %v206_v5 }
 0x1e8   :  { %v243_v50 = vperm.slane %v240_v48, 0 }
 0x1ea   :  { %v244_v51 = vadd.f32 %v243_v50, %v242_v49 }
 0x1ec   :  { %v245_v52 = vmul.f32 0.01, %v244_v51 }
 0x1ee   :  { %v246_v53 = vmax.f32 %v244_v51, %v245_v52 }
 0x1f0   :  { %264 = vmatmul.f32.vlgmr.msra.gmra.mxu2 %v246_v53 }
 0x273   :  { %v265_v55 = vpop.f32.mrf.mxu2 }
 0x274   :  { %v266_v56 = vadd.f32 %v297_v54, %v265_v55 }
 0x276   :  { %268 = vst [vmem:[#allocation10] sm:$0xff] %v266_v56 }
 0x277   :  { %279 = dma.vmem_to_hbm [thread:$0]  %s275_s9, 128, %s277_s12, [#allocation4]  }
 0x278   :  { %428 = dma.done.wait [#allocation4], 128  }
 0x279   :  { %429 = vsyncadd [#allocation4], 4294967168 }
 0x27a   :  { %284 = vsyncpa [#allocation3], 1 }
 0x27b   :  { %285 = vsyncpa [#allocation6], 1 }
 0x27c   :  { %286 = vsyncpa [#allocation9], 1 }
 0x27d   :  { %287 = vsyncpa [#allocation4], 1 }

</bundles_post_ra>
